<compile_context>
chip_gen: v7x
topology: tpu7x:2x2x1
jax: 0.10.0
libtpu: 0.0.40
codegen_flags: <defaults>
</compile_context>

<pallas_src>
import jax
import jax.numpy as jnp
from jax.experimental import pallas as pl
from jax.experimental.pallas import tpu as pltpu

STATE_DIM = 3
ACTION_DIM = 3
HIDDEN = 100

HIDDEN_PAD = 128   # lane-aligned hidden width (zeros in the padded columns)
OUT_PAD = 128      # lane-dense output width (real data in lanes [0, STATE_DIM))
MAX_TILE_M = 1024  # batch-tile ceiling; fits comfortably in v5e's 16 MiB scoped VMEM


def _round_up(x, m):
    return ((x + m - 1) // m) * m


def _mlp_kernel(s_ref, a_ref, w1s_ref, w1a_ref, b1_ref,
                w2_ref, b2_ref, w3_ref, b3_ref, o_ref):
    # Layer 1: concat(state, action) @ W1  ==  state @ W1_s + action @ W1_a
    h1 = (jnp.dot(s_ref[...], w1s_ref[...], preferred_element_type=jnp.float32)
          + jnp.dot(a_ref[...], w1a_ref[...], preferred_element_type=jnp.float32)
          + b1_ref[...])
    h1 = jnp.maximum(h1, 0.0)
    # Layer 2
    h2 = jnp.dot(h1, w2_ref[...], preferred_element_type=jnp.float32) + b2_ref[...]
    h2 = jnp.maximum(h2, 0.0)
    # Layer 3 (lane-dense 128-wide output; real result lives in lanes [0, STATE_DIM))
    o_ref[...] = jnp.dot(h2, w3_ref[...], preferred_element_type=jnp.float32) + b3_ref[...]


def _pad_params(params):
    """Zero-pad params to (8,128)-friendly shapes. Zero padding keeps the math exact."""
    w1, b1, w2, b2, w3, b3 = params
    w1 = w1.astype(jnp.float32)
    w1_s = jnp.pad(w1[:STATE_DIM], ((0, 0), (0, HIDDEN_PAD - HIDDEN)))          # (S, 128)
    w1_a = jnp.pad(w1[STATE_DIM:], ((0, 0), (0, HIDDEN_PAD - HIDDEN)))          # (A, 128)
    b1_p = jnp.pad(b1.astype(jnp.float32), ((0, 0), (0, HIDDEN_PAD - HIDDEN)))  # (1, 128)
    w2_p = jnp.pad(w2.astype(jnp.float32),
                   ((0, HIDDEN_PAD - HIDDEN), (0, HIDDEN_PAD - HIDDEN)))        # (128, 128)
    b2_p = jnp.pad(b2.astype(jnp.float32), ((0, 0), (0, HIDDEN_PAD - HIDDEN)))  # (1, 128)
    w3_p = jnp.pad(w3.astype(jnp.float32),
                   ((0, HIDDEN_PAD - HIDDEN), (0, OUT_PAD - STATE_DIM)))        # (128, 128)
    b3_p = jnp.pad(b3.astype(jnp.float32), ((0, 0), (0, OUT_PAD - STATE_DIM)))  # (1, 128)
    return w1_s, w1_a, b1_p, w2_p, b2_p, w3_p, b3_p


def absolute_dynamics_forward(state, action, params):
    """state: (..., STATE_DIM), action: (..., ACTION_DIM) -> (..., STATE_DIM)."""
    lead = state.shape[:-1]

    # Flatten leading dims (metadata-only for contiguous arrays; no concat copy).
    s2 = state.reshape(-1, STATE_DIM).astype(jnp.float32)
    a2 = action.reshape(-1, ACTION_DIM).astype(jnp.float32)
    b = s2.shape[0]

    # Batch tile: single grid step for small batches, up to MAX_TILE_M rows per
    # step otherwise (grid >= 2 for large batches -> both v7x TensorCores used).
    tile_m = min(MAX_TILE_M, _round_up(max(b, 1), 8))
    b_pad = _round_up(max(b, 1), tile_m)
    if b_pad != b:
        s2 = jnp.pad(s2, ((0, b_pad - b), (0, 0)))
        a2 = jnp.pad(a2, ((0, b_pad - b), (0, 0)))

    w1_s, w1_a, b1_p, w2_p, b2_p, w3_p, b3_p = _pad_params(params)

    grid = (b_pad // tile_m,)
    out = pl.pallas_call(
        _mlp_kernel,
        out_shape=jax.ShapeDtypeStruct((b_pad, OUT_PAD), jnp.float32),
        grid_spec=pltpu.PrefetchScalarGridSpec(
            num_scalar_prefetch=0,
            grid=grid,
            in_specs=[
                pl.BlockSpec((tile_m, STATE_DIM), lambda i: (i, 0)),        # state tile
                pl.BlockSpec((tile_m, ACTION_DIM), lambda i: (i, 0)),       # action tile
                pl.BlockSpec((STATE_DIM, HIDDEN_PAD), lambda i: (0, 0)),    # W1_s
                pl.BlockSpec((ACTION_DIM, HIDDEN_PAD), lambda i: (0, 0)),   # W1_a
                pl.BlockSpec((1, HIDDEN_PAD), lambda i: (0, 0)),            # b1
                pl.BlockSpec((HIDDEN_PAD, HIDDEN_PAD), lambda i: (0, 0)),   # W2
                pl.BlockSpec((1, HIDDEN_PAD), lambda i: (0, 0)),            # b2
                pl.BlockSpec((HIDDEN_PAD, OUT_PAD), lambda i: (0, 0)),      # W3
                pl.BlockSpec((1, OUT_PAD), lambda i: (0, 0)),               # b3
            ],
            out_specs=pl.BlockSpec((tile_m, OUT_PAD), lambda i: (i, 0)),    # lane-dense out
        ),
        compiler_params=pltpu.CompilerParams(
            dimension_semantics=("parallel",),
        ),
    )(s2, a2, w1_s, w1_a, b1_p, w2_p, b2_p, w3_p, b3_p)

    out = out[:b, :STATE_DIM]
    return out.reshape(*lead, STATE_DIM)


def init_params(key):
    """Deterministic synthetic parameters (shapes match the nn.Module, W as (in,out))."""
    ks = jax.random.split(key, 6)
    in_dim = STATE_DIM + ACTION_DIM
    w1 = jax.random.normal(ks[0], (in_dim, HIDDEN), jnp.float32) * 0.1
    b1 = jax.random.normal(ks[1], (1, HIDDEN), jnp.float32) * 0.1
    w2 = jax.random.normal(ks[2], (HIDDEN, HIDDEN), jnp.float32) * 0.1
    b2 = jax.random.normal(ks[3], (1, HIDDEN), jnp.float32) * 0.1
    w3 = jax.random.normal(ks[4], (HIDDEN, STATE_DIM), jnp.float32) * 0.1
    b3 = jax.random.normal(ks[5], (1, STATE_DIM), jnp.float32) * 0.1
    return (w1, b1, w2, b2, w3, b3)


def _reference(state, action, params):
    """Pure-JAX reference of the PyTorch forward."""
    w1, b1, w2, b2, w3, b3 = params
    x = jnp.concatenate([state, action], axis=-1)
    h1 = jnp.maximum(x @ w1 + b1[0], 0.0)
    h2 = jnp.maximum(h1 @ w2 + b2[0], 0.0)
    return h2 @ w3 + b3[0]


if __name__ == "__main__":
    key = jax.random.PRNGKey(0)
    kp, ks, ka = jax.random.split(key, 3)

    params = init_params(kp)
    batch = 16
    state = jax.random.normal(ks, (batch, STATE_DIM), jnp.float32)
    action = jax.random.normal(ka, (batch, ACTION_DIM), jnp.float32)

    out = absolute_dynamics_forward(state, action, params)
    out = jax.block_until_ready(out)

    ref = _reference(state, action, params)
    assert out.shape == (batch, STATE_DIM)
    assert jnp.allclose(out, ref, atol=1e-5, rtol=1e-5), "mismatch vs reference"

    # Also exercise arbitrary leading dims (matches the nn.Module contract).
    state3 = state.reshape(2, 8, STATE_DIM)
    action3 = action.reshape(2, 8, ACTION_DIM)
    out3 = jax.block_until_ready(absolute_dynamics_forward(state3, action3, params))
    assert out3.shape == (2, 8, STATE_DIM)
    assert jnp.allclose(out3.reshape(batch, STATE_DIM), ref, atol=1e-5, rtol=1e-5)

    print("KERNEL_OK")
</pallas_src>

<mosaic_0001>
module attributes {stable_mosaic.version = 11 : i64} {
  func.func @_mlp_kernel(%arg0: i32, %arg1: memref<16x3xf32, #tpu.memory_space<vmem>>, %arg2: memref<16x3xf32, #tpu.memory_space<vmem>>, %arg3: memref<3x128xf32, #tpu.memory_space<vmem>>, %arg4: memref<3x128xf32, #tpu.memory_space<vmem>>, %arg5: memref<1x128xf32, #tpu.memory_space<vmem>>, %arg6: memref<128x128xf32, #tpu.memory_space<vmem>>, %arg7: memref<1x128xf32, #tpu.memory_space<vmem>>, %arg8: memref<128x128xf32, #tpu.memory_space<vmem>>, %arg9: memref<1x128xf32, #tpu.memory_space<vmem>>, %arg10: memref<16x128xf32, #tpu.memory_space<vmem>>) attributes {dimension_semantics = [#tpu.dimension_semantics<parallel>], iteration_bounds = array<i64: 1>, scalar_prefetch = 0 : i64, scratch_operands = 0 : i64, tpu.core_type = #tpu.core_type<tc>, window_params = [{transform_indices = @transform_0, window_bounds = array<i64: 16, 3>}, {transform_indices = @transform_1, window_bounds = array<i64: 16, 3>}, {pipeline_mode = #tpu.pipeline_mode<synchronous>, transform_indices = @transform_2, window_bounds = array<i64: 3, 128>}, {pipeline_mode = #tpu.pipeline_mode<synchronous>, transform_indices = @transform_3, window_bounds = array<i64: 3, 128>}, {pipeline_mode = #tpu.pipeline_mode<synchronous>, transform_indices = @transform_4, window_bounds = array<i64: 1, 128>}, {pipeline_mode = #tpu.pipeline_mode<synchronous>, transform_indices = @transform_5, window_bounds = array<i64: 128, 128>}, {pipeline_mode = #tpu.pipeline_mode<synchronous>, transform_indices = @transform_6, window_bounds = array<i64: 1, 128>}, {pipeline_mode = #tpu.pipeline_mode<synchronous>, transform_indices = @transform_7, window_bounds = array<i64: 128, 128>}, {pipeline_mode = #tpu.pipeline_mode<synchronous>, transform_indices = @transform_8, window_bounds = array<i64: 1, 128>}, {transform_indices = @transform_9, window_bounds = array<i64: 16, 128>}]} {
    %c0 = arith.constant 0 : index
    %c0_0 = arith.constant 0 : index
    %0 = vector.load %arg1[%c0, %c0_0] : memref<16x3xf32, #tpu.memory_space<vmem>>, vector<16x3xf32>
    %c0_1 = arith.constant 0 : index
    %c0_2 = arith.constant 0 : index
    %1 = vector.load %arg3[%c0_1, %c0_2] : memref<3x128xf32, #tpu.memory_space<vmem>>, vector<3x128xf32>
    %cst = arith.constant dense<0.000000e+00> : vector<16x128xf32>
    %2 = tpu.matmul %0, %1, %cst {dimension_numbers = #tpu.dot_dimension_numbers<[1], [0], [0], [1], [0, 0, 1, 1], [], []>} : vector<16x3xf32>, vector<3x128xf32>, vector<16x128xf32> -> vector<16x128xf32>
    %c0_3 = arith.constant 0 : index
    %c0_4 = arith.constant 0 : index
    %3 = vector.load %arg2[%c0_3, %c0_4] : memref<16x3xf32, #tpu.memory_space<vmem>>, vector<16x3xf32>
    %c0_5 = arith.constant 0 : index
    %c0_6 = arith.constant 0 : index
    %4 = vector.load %arg4[%c0_5, %c0_6] : memref<3x128xf32, #tpu.memory_space<vmem>>, vector<3x128xf32>
    %cst_7 = arith.constant dense<0.000000e+00> : vector<16x128xf32>
    %5 = tpu.matmul %3, %4, %cst_7 {dimension_numbers = #tpu.dot_dimension_numbers<[1], [0], [0], [1], [0, 0, 1, 1], [], []>} : vector<16x3xf32>, vector<3x128xf32>, vector<16x128xf32> -> vector<16x128xf32>
    %6 = arith.addf %2, %5 : vector<16x128xf32>
    %c0_8 = arith.constant 0 : index
    %c0_9 = arith.constant 0 : index
    %7 = vector.load %arg5[%c0_8, %c0_9] : memref<1x128xf32, #tpu.memory_space<vmem>>, vector<1x128xf32>
    %8 = vector.broadcast %7 : vector<1x128xf32> to vector<16x128xf32>
    %9 = arith.addf %6, %8 : vector<16x128xf32>
    %cst_10 = arith.constant 0.000000e+00 : f32
    %10 = vector.broadcast %cst_10 : f32 to vector<16x128xf32>
    %11 = arith.maximumf %9, %10 : vector<16x128xf32>
    %c0_11 = arith.constant 0 : index
    %c0_12 = arith.constant 0 : index
    %12 = vector.load %arg6[%c0_11, %c0_12] : memref<128x128xf32, #tpu.memory_space<vmem>>, vector<128x128xf32>
    %cst_13 = arith.constant dense<0.000000e+00> : vector<16x128xf32>
    %13 = tpu.matmul %11, %12, %cst_13 {dimension_numbers = #tpu.dot_dimension_numbers<[1], [0], [0], [1], [0, 0, 1, 1], [], []>} : vector<16x128xf32>, vector<128x128xf32>, vector<16x128xf32> -> vector<16x128xf32>
    %c0_14 = arith.constant 0 : index
    %c0_15 = arith.constant 0 : index
    %14 = vector.load %arg7[%c0_14, %c0_15] : memref<1x128xf32, #tpu.memory_space<vmem>>, vector<1x128xf32>
    %15 = vector.broadcast %14 : vector<1x128xf32> to vector<16x128xf32>
    %16 = arith.addf %13, %15 : vector<16x128xf32>
    %cst_16 = arith.constant 0.000000e+00 : f32
    %17 = vector.broadcast %cst_16 : f32 to vector<16x128xf32>
    %18 = arith.maximumf %16, %17 : vector<16x128xf32>
    %c0_17 = arith.constant 0 : index
    %c0_18 = arith.constant 0 : index
    %19 = vector.load %arg8[%c0_17, %c0_18] : memref<128x128xf32, #tpu.memory_space<vmem>>, vector<128x128xf32>
    %cst_19 = arith.constant dense<0.000000e+00> : vector<16x128xf32>
    %20 = tpu.matmul %18, %19, %cst_19 {dimension_numbers = #tpu.dot_dimension_numbers<[1], [0], [0], [1], [0, 0, 1, 1], [], []>} : vector<16x128xf32>, vector<128x128xf32>, vector<16x128xf32> -> vector<16x128xf32>
    %c0_20 = arith.constant 0 : index
    %c0_21 = arith.constant 0 : index
    %21 = vector.load %arg9[%c0_20, %c0_21] : memref<1x128xf32, #tpu.memory_space<vmem>>, vector<1x128xf32>
    %22 = vector.broadcast %21 : vector<1x128xf32> to vector<16x128xf32>
    %23 = arith.addf %20, %22 : vector<16x128xf32>
    %c0_22 = arith.constant 0 : index
    %c0_23 = arith.constant 0 : index
    %24 = vector.load %arg10[%c0_22, %c0_23] : memref<16x128xf32, #tpu.memory_space<vmem>>, vector<16x128xf32>
    tpu.vector_store %arg10[%c0_22, %c0_23], %23 {strides = array<i32>} : memref<16x128xf32, #tpu.memory_space<vmem>>, vector<16x128xf32>,
    return
  }
  func.func @transform_0(%arg0: i32) -> (i32, i32) {
    %c0_i32 = arith.constant 0 : i32
    %c0_i32_0 = arith.constant 0 : i32
    return %arg0, %c0_i32 : i32, i32
  }
  func.func @transform_1(%arg0: i32) -> (i32, i32) {
    %c0_i32 = arith.constant 0 : i32
    %c0_i32_0 = arith.constant 0 : i32
    return %arg0, %c0_i32 : i32, i32
  }
  func.func @transform_2(%arg0: i32) -> (i32, i32) {
    %c0_i32 = arith.constant 0 : i32
    %c0_i32_0 = arith.constant 0 : i32
    %c0_i32_1 = arith.constant 0 : i32
    return %c0_i32, %c0_i32_0 : i32, i32
  }
  func.func @transform_3(%arg0: i32) -> (i32, i32) {
    %c0_i32 = arith.constant 0 : i32
    %c0_i32_0 = arith.constant 0 : i32
    %c0_i32_1 = arith.constant 0 : i32
    return %c0_i32, %c0_i32_0 : i32, i32
  }
  func.func @transform_4(%arg0: i32) -> (i32, i32) {
    %c0_i32 = arith.constant 0 : i32
    %c0_i32_0 = arith.constant 0 : i32
    %c0_i32_1 = arith.constant 0 : i32
    return %c0_i32, %c0_i32_0 : i32, i32
  }
  func.func @transform_5(%arg0: i32) -> (i32, i32) {
    %c0_i32 = arith.constant 0 : i32
    %c0_i32_0 = arith.constant 0 : i32
    %c0_i32_1 = arith.constant 0 : i32
    return %c0_i32, %c0_i32_0 : i32, i32
  }
  func.func @transform_6(%arg0: i32) -> (i32, i32) {
    %c0_i32 = arith.constant 0 : i32
    %c0_i32_0 = arith.constant 0 : i32
    %c0_i32_1 = arith.constant 0 : i32
    return %c0_i32, %c0_i32_0 : i32, i32
  }
  func.func @transform_7(%arg0: i32) -> (i32, i32) {
    %c0_i32 = arith.constant 0 : i32
    %c0_i32_0 = arith.constant 0 : i32
    %c0_i32_1 = arith.constant 0 : i32
    return %c0_i32, %c0_i32_0 : i32, i32
  }
  func.func @transform_8(%arg0: i32) -> (i32, i32) {
    %c0_i32 = arith.constant 0 : i32
    %c0_i32_0 = arith.constant 0 : i32
    %c0_i32_1 = arith.constant 0 : i32
    return %c0_i32, %c0_i32_0 : i32, i32
  }
  func.func @transform_9(%arg0: i32) -> (i32, i32) {
    %c0_i32 = arith.constant 0 : i32
    %c0_i32_0 = arith.constant 0 : i32
    return %arg0, %c0_i32 : i32, i32
  }
}

</mosaic_0001>

<bundles_post_ra>
// kernel: tpu_custom_call.1
= control target key start
LH: loop header
LB: loop body
LE: loop exit
PB: predicated region body
PF: predicated region fallthrough
CT: control target
= control target key end

     0   :  { %14 = vsyncpa [#allocation3], 0  ;;  %s871_s0 = inlined_call_operand.vmem [shape: f32[16,3], index: 0, kind: input, shape index: {}]   ;;  %s872_s1 = inlined_call_operand.vmem [shape: f32[16,3], index: 1, kind: input, shape index: {}]   ;;  %s873_s2 = inlined_call_operand.vmem [shape: f32[3,128], index: 2, kind: input, shape index: {}]   ;;  %s874_s3 = inlined_call_operand.vmem [shape: f32[3,128], index: 3, kind: input, shape index: {}]   ;;  %s875_s4 = inlined_call_operand.vmem [shape: f32[1,128], index: 4, kind: input, shape index: {}]   ;;  %s876_s5 = inlined_call_operand.hbm [shape: f32[128,128], index: 5, kind: input, shape index: {}]   ;;  %s877_s6 = inlined_call_operand.vmem [shape: f32[1,128], index: 6, kind: input, shape index: {}]   ;;  %s878_s7 = inlined_call_operand.hbm [shape: f32[128,128], index: 7, kind: input, shape index: {}]   ;;  %s879_s8 = inlined_call_operand.vmem [shape: f32[1,128], index: 8, kind: input, shape index: {}]   ;;  %s880_s9 = inlined_call_operand.hbm [shape: f32[16,128], index: 9, kind: output, shape index: {}]  }
   0x1   :  { %15 = vsyncpa [#allocation6], 0 }
   0x2   :  { %16 = vsyncpa [#allocation4], 0  ;;  %s740_s30 = smov [#allocation2]   ;;  %s668_s13 = scalar_lea.hbm %s876_s5, 2048 }
   0x3   :  { %s32_s10 = sshll.u32 %s740_s30, 4  ;;  %p669_p0 = scmp.ne.s32.totalorder %s876_s5, %s668_s13  ;;  %s33_s10 = int_to_ptr.vmem [resolvable:$true] %s32_s10 }
   0x4   :  { %p672_p1 = scmp.lt.u32.totalorder %s668_s13, %s876_s5 }
   0x6   :  { %p674_p2 = pnand %p672_p1, %p669_p0 }
   0x8   :  { %677 = shalt.err (!%p674_p2)
}
   0x9   :  { %s678_s18 = scalar_lea.vmem %s33_s10, 2048  ;;  %p683_p4 = scmp.lt.s32.totalorder %s33_s10, %s33_s10 }
   0xa   :  { %p679_p3 = scmp.ne.s32.totalorder %s33_s10, %s678_s18  ;;  %p684_p5 = scmp.lt.s32.totalorder %s678_s18, %s678_s18 }
   0xc   :  { %p685_p6 = por %p684_p5, %p683_p4 }
   0xe   :  { %p686_p7 = pnand %p685_p6, %p679_p3 }
  0x10   :  { %689 = shalt.err (!%p686_p7)
}
  0x11   :  { %s741_s19 = smov 128   ;;  %s742_s20 = smov 8  }
  0x12   :  { %38 = dma.hbm_to_vmem [thread:$0]  %s876_s5, 2048, %s33_s10, [#allocation3], %s741_s19, %s741_s19, %s742_s20  }
  0x13   :  { %s743_s23 = smov [#allocation5]   ;;  %s690_s27 = scalar_lea.hbm %s878_s7, 2048 }
  0x14   :  { %s46_s24 = sshll.u32 %s743_s23, 4  ;;  %p691_p8 = scmp.ne.s32.totalorder %s878_s7, %s690_s27  ;;  %s47_s24 = int_to_ptr.vmem [resolvable:$true] %s46_s24 }
  0x15   :  { %p694_p9 = scmp.lt.u32.totalorder %s690_s27, %s878_s7 }
  0x17   :  { %p696_p10 = pnand %p694_p9, %p691_p8 }
  0x19   :  { %699 = shalt.err (!%p696_p10)
}
  0x1a   :  { %s700_s12 = scalar_lea.vmem %s47_s24, 2048  ;;  %p705_p12 = scmp.lt.s32.totalorder %s47_s24, %s47_s24 }
  0x1b   :  { %p701_p11 = scmp.ne.s32.totalorder %s47_s24, %s700_s12  ;;  %p706_p13 = scmp.lt.s32.totalorder %s700_s12, %s700_s12 }
  0x1d   :  { %p707_p0 = por %p706_p13, %p705_p12 }
  0x1f   :  { %p708_p1 = pnand %p707_p0, %p701_p11 }
  0x21   :  { %711 = shalt.err (!%p708_p1)
}
  0x22   :  { %52 = dma.hbm_to_vmem [thread:$0]  %s878_s7, 2048, %s47_s24, [#allocation6], %s741_s19, %s741_s19, %s742_s20  }
  0x23   :  { %734 = dma.done.wait [#allocation3], 2048  }
  0x24   :  { %735 = vsyncadd [#allocation3], 4294965248 }
  0x25   :  { %736 = dma.done.wait [#allocation6], 2048  }
  0x26   :  { %737 = vsyncadd [#allocation6], 4294965248  ;;  %vm74_vm0 = vcmask 1042432   ;;  %vm67_vm1 = vcmask 23552   ;;  %v66_v0 = vld [vmem:[%s874_s3] sm:$0x7] }
  0x27   :  { %v63_v1 = vld [vmem:[%s873_s2] sm:$0x7]  ;;  %517 = vmatprep.subr.msk.mxu1 %vm74_vm0, %v66_v0  ;;  %v65_v4 = vld [vmem:[%s872_s1 + $0x8] sm:$0xff]  ;;  %v250_v8 = vld [vmem:[#allocation2 + $0x10] sm:$0xff]  ;;  %s744_s27 = smov [#allocation7]  }
  0x28   :  { %v64_v2 = vld [vmem:[%s872_s1] sm:$0xff]  ;;  %522 = vmatprep.subr.msk.mxu0 %vm74_vm0, %v63_v1  ;;  %v62_v5 = vld [vmem:[%s871_s0 + $0x8] sm:$0xff]  ;;  %518 = vmatpush3.msk.msra.mxu1 %vm74_vm0, %v66_v0  ;;  %v251_v10 = vld [vmem:[#allocation2 + $0x18] sm:$0xff]  ;;  %s453_s28 = sshll.u32 %s744_s27, 4  ;;  %s454_s28 = int_to_ptr.vmem [resolvable:$true] %s453_s28 }
  0x29   :  { %v61_v3 = vld [vmem:[%s871_s0] sm:$0xff]  ;;  %519 = vmatprep.mubr.msk.f32.mxu1 %vm67_vm1, %v64_v2  ;;  %v249_v7 = vld [vmem:[#allocation2 + $0x8] sm:$0xff]  ;;  %523 = vmatpush3.msk.msra.mxu0 %vm74_vm0, %v63_v1  ;;  %v601_v11 = vpack.c.bf16 %v251_v10, %v250_v8  ;;  %v254_v15 = vld [vmem:[#allocation2 + $0x30] sm:$0xff]  ;;  %p717_p3 = scmp.lt.s32.totalorder %s454_s28, %s454_s28 }
  0x2a   :  { %v248_v6 = vld [vmem:[#allocation2] sm:$0xff]  ;;  %524 = vmatprep.mubr.msk.f32.mxu0 %vm67_vm1, %v61_v3  ;;  %520 = vmatmul.mubr.msk.f32.vlgmr.msra.gmra.mrb[0].mxu1 %vm67_vm1, %v65_v4  ;;  %v253_v13 = vld [vmem:[#allocation2 + $0x28] sm:$0xff]  ;;  %v255_v16 = vld [vmem:[#allocation2 + $0x38] sm:$0xff] }
  0x2b   :  { %v597_v9 = vpack.c.bf16 %v249_v7, %v248_v6  ;;  %525 = vmatmul.mubr.msk.f32.vlgmr.msra.gmra.mrb[0].mxu0 %vm67_vm1, %v62_v5  ;;  %v252_v12 = vld [vmem:[#allocation2 + $0x20] sm:$0xff]  ;;  %v609_v17 = vpack.c.bf16 %v255_v16, %v254_v15  ;;  %v257_v19 = vld [vmem:[#allocation2 + $0x48] sm:$0xff]  ;;  %v258_v21 = vld [vmem:[#allocation2 + $0x50] sm:$0xff] }
  0x2c   :  { %v605_v14 = vpack.c.bf16 %v253_v13, %v252_v12  ;;  %v256_v18 = vld [vmem:[#allocation2 + $0x40] sm:$0xff]  ;;  %v259_v22 = vld [vmem:[#allocation2 + $0x58] sm:$0xff]  ;;  %v261_v25 = vld [vmem:[#allocation2 + $0x68] sm:$0xff] }
  0x2d   :  { %598 = vmatprep.subr.bf16.mxu1 %v597_v9  ;;  %v613_v20 = vpack.c.bf16 %v257_v19, %v256_v18  ;;  %v617_v23 = vpack.c.bf16 %v259_v22, %v258_v21  ;;  %v260_v24 = vld [vmem:[#allocation2 + $0x60] sm:$0xff]  ;;  %v262_v27 = vld [vmem:[#allocation2 + $0x70] sm:$0xff]  ;;  %v263_v28 = vld [vmem:[#allocation2 + $0x78] sm:$0xff] }
  0x2e   :  { %600 = vmatpush3.bf16.msra.mxu1 %v597_v9  ;;  %v621_v26 = vpack.c.bf16 %v261_v25, %v260_v24  ;;  %v625_v29 = vpack.c.bf16 %v263_v28, %v262_v27  ;;  %v348_v30 = vld [vmem:[#allocation5] sm:$0xff]  ;;  %v349_v31 = vld [vmem:[#allocation5 + $0x8] sm:$0xff]  ;;  %v350_v32 = vld [vmem:[#allocation5 + $0x10] sm:$0xff] }
  0x2f   :  { %602 = vmatprep.subr.bf16.mxu1 %v601_v11  ;;  %v629_v33 = vpack.c.bf16 %v349_v31, %v348_v30  ;;  %v351_v34 = vld [vmem:[#allocation5 + $0x18] sm:$0xff]  ;;  %v352_v36 = vld [vmem:[#allocation5 + $0x20] sm:$0xff]  ;;  %v353_v37 = vld [vmem:[#allocation5 + $0x28] sm:$0xff] }
  0x30   :  { %v633_v35 = vpack.c.bf16 %v351_v34, %v350_v32  ;;  %v637_v38 = vpack.c.bf16 %v353_v37, %v352_v36  ;;  %v354_v39 = vld [vmem:[#allocation5 + $0x30] sm:$0xff]  ;;  %v355_v40 = vld [vmem:[#allocation5 + $0x38] sm:$0xff]  ;;  %v356_v42 = vld [vmem:[#allocation5 + $0x40] sm:$0xff] }
  0x31   :  { %630 = vmatprep.subr.bf16.mxu0 %v629_v33  ;;  %v641_v41 = vpack.c.bf16 %v355_v40, %v354_v39  ;;  %v357_v43 = vld [vmem:[#allocation5 + $0x48] sm:$0xff]  ;;  %v358_v45 = vld [vmem:[#allocation5 + $0x50] sm:$0xff]  ;;  %v359_v46 = vld [vmem:[#allocation5 + $0x58] sm:$0xff] }
  0x32   :  { %604 = vmatpush3.bf16.msra.mxu1 %v601_v11  ;;  %632 = vmatpush3.bf16.msra.mxu0 %v629_v33  ;;  %v645_v44 = vpack.c.bf16 %v357_v43, %v356_v42  ;;  %v649_v47 = vpack.c.bf16 %v359_v46, %v358_v45  ;;  %v360_v48 = vld [vmem:[#allocation5 + $0x60] sm:$0xff]  ;;  %v361_v49 = vld [vmem:[#allocation5 + $0x68] sm:$0xff]  ;;  %v362_v62 = vld [vmem:[#allocation5 + $0x70] sm:$0xff] }
  0x33   :  { %606 = vmatprep.subr.bf16.mxu1 %v605_v14  ;;  %634 = vmatprep.subr.bf16.mxu0 %v633_v35  ;;  %v653_v50 = vpack.c.bf16 %v361_v49, %v360_v48  ;;  %v472_v53 = vld [vmem:[%s875_s4] ss:$0 sm:$0xff]  ;;  %v363_v63 = vld [vmem:[#allocation5 + $0x78] sm:$0xff] }
  0x34   :  { %v657_v0 = vpack.c.bf16 %v363_v63, %v362_v62  ;;  %v473_v1 = vld [vmem:[%s877_s6] ss:$0 sm:$0xff]  ;;  %s712_s6 = scalar_lea.vmem %s454_s28, 256 }
  0x35   :  { %v474_v8 = vld [vmem:[%s879_s8] ss:$0 sm:$0xff]  ;;  %p713_p2 = scmp.ne.s32.totalorder %s454_s28, %s712_s6  ;;  %p718_p4 = scmp.lt.s32.totalorder %s712_s6, %s712_s6 }
  0x36   :  { %608 = vmatpush3.bf16.msra.mxu1 %v605_v14  ;;  %636 = vmatpush3.bf16.msra.mxu0 %v633_v35 }
  0x37   :  { %610 = vmatprep.subr.bf16.mxu1 %v609_v17  ;;  %638 = vmatprep.subr.bf16.mxu0 %v637_v38  ;;  %p719_p5 = por %p718_p4, %p717_p3 }
  0x39   :  { %p720_p6 = pnand %p719_p5, %p713_p2 }
  0x3a   :  { %612 = vmatpush3.bf16.msra.mxu1 %v609_v17  ;;  %640 = vmatpush3.bf16.msra.mxu0 %v637_v38 }
  0x3b   :  { %614 = vmatprep.subr.bf16.mxu1 %v613_v20  ;;  %642 = vmatprep.subr.bf16.mxu0 %v641_v41 }
  0x3e   :  { %616 = vmatpush3.bf16.msra.mxu1 %v613_v20  ;;  %644 = vmatpush3.bf16.msra.mxu0 %v641_v41 }
  0x3f   :  { %618 = vmatprep.subr.bf16.mxu1 %v617_v23  ;;  %646 = vmatprep.subr.bf16.mxu0 %v645_v44 }
  0x42   :  { %620 = vmatpush3.bf16.msra.mxu1 %v617_v23  ;;  %648 = vmatpush3.bf16.msra.mxu0 %v645_v44 }
  0x43   :  { %622 = vmatprep.subr.bf16.mxu1 %v621_v26  ;;  %650 = vmatprep.subr.bf16.mxu0 %v649_v47 }
  0x46   :  { %624 = vmatpush3.bf16.msra.mxu1 %v621_v26  ;;  %652 = vmatpush3.bf16.msra.mxu0 %v649_v47 }
  0x47   :  { %626 = vmatprep.subr.bf16.mxu1 %v625_v29  ;;  %654 = vmatprep.subr.bf16.mxu0 %v653_v50 }
  0x4a   :  { %628 = vmatpush3.bf16.msra.mxu1 %v625_v29  ;;  %656 = vmatpush3.bf16.msra.mxu0 %v653_v50 }
  0x4b   :  { %658 = vmatprep.subr.bf16.mxu0 %v657_v0 }
  0x4e   :  { %660 = vmatpush3.bf16.msra.mxu0 %v657_v0 }
  0xfd   :  { %v521_v51 = vpop.f32.mrb[0].mxu1 }
  0xfe   :  { %v526_v52 = vpop.f32.mrb[0].mxu0  ;;  %v144_v55 = vpop.f32.mrb[1].mxu1 }
  0xff   :  { %v234_v54 = vadd.f32 %v526_v52, %v521_v51  ;;  %v228_v56 = vpop.f32.mrb[1].mxu0 }
 0x100   :  { %v229_v57 = vadd.f32 %v228_v56, %v144_v55 }
 0x101   :  { %v245_v58 = vadd.f32 %v472_v53, %v234_v54 }
 0x102   :  { %v244_v59 = vadd.f32 %v472_v53, %v229_v57 }
 0x103   :  { %v247_v61 = vmax.f32 %v245_v58, 0.0 }
 0x104   :  { %v246_v60 = vmax.f32 %v244_v59, 0.0 }
 0x106   :  { %559 = vmatprep.mubr.f32.mxu1 %v246_v60 }
 0x107   :  { %560 = vmatmul.mubr.f32.vlgmr.msra.gmra.mrb[2].mxu1 %v247_v61 }
 0x1da   :  { %v561_v2 = vpop.f32.mrb[2].mxu1 }
 0x1db   :  { %v343_v3 = vadd.f32 %v561_v2, %v473_v1  ;;  %v337_v4 = vpop.f32.mrb[3].mxu1 }
 0x1dc   :  { %v338_v5 = vadd.f32 %v473_v1, %v337_v4 }
 0x1dd   :  { %v347_v7 = vmax.f32 %v343_v3, 0.0 }
 0x1de   :  { %v346_v6 = vmax.f32 %v338_v5, 0.0 }
 0x1e0   :  { %594 = vmatprep.mubr.f32.mxu0 %v346_v6 }
 0x1e1   :  { %595 = vmatmul.mubr.f32.vlgmr.msra.gmra.mrb[2].mxu0 %v347_v7 }
 0x2b4   :  { %v596_v9 = vpop.f32.mrb[2].mxu0 }
 0x2b5   :  { %v443_v10 = vadd.f32 %v596_v9, %v474_v8  ;;  %v437_v11 = vpop.f32.mrb[3].mxu0 }
 0x2b6   :  { %v438_v12 = vadd.f32 %v474_v8, %v437_v11 }
 0x2b7   :  { %447 = vst [vmem:[#allocation7 + $0x8] sm:$0xff] %v443_v10 }
 0x2b8   :  { %446 = vst [vmem:[#allocation7] sm:$0xff] %v438_v12 }
 0x2b9   :  { %723 = shalt.err (!%p720_p6)
}
 0x2ba   :  { %s724_s8 = scalar_lea.hbm %s880_s9, 256 }
 0x2bb   :  { %p725_p7 = scmp.ne.s32.totalorder %s880_s9, %s724_s8  ;;  %p728_p8 = scmp.lt.u32.totalorder %s724_s8, %s880_s9 }
 0x2bd   :  { %p730_p9 = pnand %p728_p8, %p725_p7 }
 0x2bf   :  { %733 = shalt.err (!%p730_p9)
}
 0x2c0   :  { %459 = dma.vmem_to_hbm [thread:$0]  %s454_s28, 256, %s880_s9, [#allocation4], %s741_s19, %s741_s19, %s742_s20  }
 0x2c1   :  { %738 = dma.done.wait [#allocation4], 256  }
 0x2c2   :  { %739 = vsyncadd [#allocation4], 4294967040 }
 0x2c3   :  { %463 = vsyncpa [#allocation3], 1 }
 0x2c4   :  { %464 = vsyncpa [#allocation6], 1 }
 0x2c5   :  { %465 = vsyncpa [#allocation4], 1 }

</bundles_post_ra>
